<compile_context>
chip_gen: v5e
topology: v5e:2x2
jax: 0.10.0
libtpu: 0.0.40
codegen_flags: <defaults>
</compile_context>

<pallas_src>
import functools
import numpy as np

import jax
import jax.numpy as jnp
from jax.experimental import pallas as pl
from jax.experimental.pallas import tpu as pltpu

_LANE = 128  # TPU lane width: outputs narrower than this use masked stores.


def _extract_keys_kernel(x_ref, *out_refs, starts, flat_sizes):
    """Copy contiguous static, 128-lane-aligned slices of the feature axis."""
    for out_ref, start, flat in zip(out_refs, starts, flat_sizes):
        out_ref[...] = x_ref[:, start:start + flat]


def _sublane_min(dtype):
    itemsize = jnp.dtype(dtype).itemsize
    return max(8, 32 // max(itemsize, 1))  # 8 f32 / 16 bf16 / 32 int8


def _round_up(v, m):
    return ((v + m - 1) // m) * m


def _vmem_budget_and_limit():
    """Generation-aware (per-step VMEM byte budget, vmem_limit_bytes)."""
    try:
        cap = int(pltpu.get_tpu_info().vmem_capacity_bytes)
    except Exception:
        cap = None
    if cap is not None and cap >= 100 * 1024 * 1024:
        # v5e / v6e: 128 MiB physical VMEM -> bigger blocks, fewer grid steps.
        return 28 * 1024 * 1024, 64 * 1024 * 1024
    # v7x (64 MiB per TensorCore) or unknown -> conservative, safe everywhere.
    return 12 * 1024 * 1024, 32 * 1024 * 1024


def extract_keys(x, keys, shapes, postproc_fn=None, block_batch=None):
    """Pallas implementation of ExtractKeys.forward for a flat tensor input.

    x:      jnp array of shape (..., F) where F == sum(prod(s) for s in shapes)
    keys:   list of str
    shapes: list of tuple[int] (per-key shapes)
    Returns a dict {key: array of shape (..., *shape)}.
    """
    assert len(keys) == len(shapes)
    flat_sizes = [int(np.prod(s)) for s in shapes]
    starts = [int(v) for v in np.cumsum([0] + flat_sizes[:-1])]
    total = int(sum(flat_sizes))
    prepend_shape = tuple(x.shape[:-1])
    assert x.shape[-1] == total, (x.shape[-1], total, keys)

    batch = int(np.prod(prepend_shape)) if len(prepend_shape) > 0 else 1
    x2d = x.reshape(batch, total)
    itemsize = jnp.dtype(x2d.dtype).itemsize
    sub = _sublane_min(x2d.dtype)

    # Key routing:
    #  * Pallas path: lane-dense (flat >= 128) AND 128-lane-aligned start
    #    -> in-kernel slice is a pure vld->vst copy (no XLU relayout).
    #  * XLA path: tiny keys (< 128 lanes -> masked partial stores) and
    #    unaligned big keys (relayout copy not worth it, esp. on v5e).
    kern_idx = [i for i, f in enumerate(flat_sizes)
                if f >= _LANE and starts[i] % _LANE == 0]
    xla_idx = [i for i in range(len(keys)) if i not in set(kern_idx)]

    result = {}

    if kern_idx:
        kern_starts = tuple(starts[i] for i in kern_idx)
        kern_flats = tuple(flat_sizes[i] for i in kern_idx)
        sum_kern = int(sum(kern_flats))

        # Narrow the input block to the columns the kernel actually uses,
        # rounded up to a 128-lane boundary (trailing small-key columns are
        # sliced by XLA below and never DMA'd into VMEM here).
        span_hi = max(s + f for s, f in zip(kern_starts, kern_flats))
        span_cols = min(total, _round_up(span_hi, _LANE))
        if span_cols != total and span_cols % _LANE != 0:  # defensive
            span_cols = total

        # --- batch tile: byte-budgeted, with a minimum-step cap -------------
        budget_bytes, vmem_limit = _vmem_budget_and_limit()
        # per-step VMEM = (input block + all output blocks) * 2 (double buf)
        row_bytes = (span_cols + sum_kern) * itemsize
        tb_budget = budget_bytes // max(2 * row_bytes, 1)

        if block_batch is not None:
            tb = max(1, int(block_batch))
        else:
            tb = max(sub, int(tb_budget))
            # Keep >= ~4 grid steps whenever the batch allows: overlaps the
            # write-back of step i with the read of step i+1 and lets v7x's
            # two TensorCores split the "parallel" batch axis.
            min_steps = 4
            if batch >= min_steps * sub:
                tb = min(tb, batch // min_steps)

        if tb >= batch:
            tb = batch  # single block == full array dim (no 8-divisibility needed)
        else:
            tb = max(sub, (tb // sub) * sub)  # sublane minimum on the batch block dim
        grid = (pl.cdiv(batch, tb),)

        kernel = functools.partial(
            _extract_keys_kernel, starts=kern_starts, flat_sizes=kern_flats)

        out_shapes = tuple(
            jax.ShapeDtypeStruct((batch, f), x2d.dtype) for f in kern_flats)

        bytes_accessed = batch * span_cols * itemsize \
            + batch * sum_kern * itemsize

        outs = pl.pallas_call(
            kernel,
            out_shape=out_shapes,
            grid=grid,
            in_specs=[pl.BlockSpec((tb, span_cols), lambda i: (i, 0))],
            out_specs=tuple(
                pl.BlockSpec((tb, f), lambda i: (i, 0)) for f in kern_flats),
            compiler_params=pltpu.CompilerParams(
                dimension_semantics=("parallel",),
                vmem_limit_bytes=vmem_limit),
            cost_estimate=pl.CostEstimate(
                flops=0, transcendentals=0, bytes_accessed=int(bytes_accessed)),
        )(x2d)

        for idx, o in zip(kern_idx, outs):
            result[keys[idx]] = o.reshape(prepend_shape + tuple(shapes[idx]))

    # Tiny / unaligned keys: plain XLA slice + reshape (no kernel round-trip).
    for idx in xla_idx:
        lo, f = starts[idx], flat_sizes[idx]
        sl = jax.lax.slice_in_dim(x2d, lo, lo + f, axis=1)
        result[keys[idx]] = sl.reshape(prepend_shape + tuple(shapes[idx]))

    # Preserve the module's key ordering.
    result = {k: result[k] for k in keys}

    if postproc_fn is not None:
        result = postproc_fn(result)
    return result
    # TODO(synk): from_key=... path (AttrDict input merge / leaf_copy) is pure
    # python dict plumbing with no tensor compute; omitted from the kernel.


def _ref_extract(x, keys, shapes):
    pre = x.shape[:-1]
    d, idx = {}, 0
    for k, s in zip(keys, shapes):
        f = int(np.prod(s))
        d[k] = x[..., idx:idx + f].reshape(pre + tuple(s))
        idx += f
    return d


def _check(x, keys, shapes, **kw):
    out = jax.block_until_ready(extract_keys(x, keys, shapes, **kw))
    ref = _ref_extract(x, keys, shapes)
    ok = True
    for k, s in zip(keys, shapes):
        ok &= out[k].shape == tuple(x.shape[:-1]) + tuple(s)
        ok &= bool(jnp.array_equal(out[k], ref[k]))
    return ok


if __name__ == "__main__":
    key = jax.random.PRNGKey(0)
    prepend = (4, 8)  # 32 rows total
    k1, k2, k3 = jax.random.split(key, 3)
    ok = True

    # Config 1: [state (8,32)=256 | action (128,) | reward (6,)] -> total 390.
    keys1, shapes1 = ["state", "action", "reward"], [(8, 32), (128,), (6,)]
    f1 = sum(int(np.prod(s)) for s in shapes1)
    x1 = jax.random.normal(k1, prepend + (f1,), dtype=jnp.float32)
    ok &= _check(x1, keys1, shapes1)                  # auto tiling (>=4 grid steps)
    ok &= _check(x1, keys1, shapes1, block_batch=8)   # explicit batch tiling
    ok &= _check(x1, keys1, shapes1, block_batch=64)  # single-block path

    # Config 2: aligned big + tiny + unaligned big -> mixed Pallas/XLA routing
    # and span narrowing (kernel reads only the first 128 columns).
    keys2, shapes2 = ["s", "a", "r"], [(128,), (3,), (16, 16)]
    f2 = sum(int(np.prod(s)) for s in shapes2)
    x2 = jax.random.normal(k2, prepend + (f2,), dtype=jnp.float32)
    ok &= _check(x2, keys2, shapes2)

    # Config 3: no lane-dense aligned keys at all -> pure XLA fallback.
    keys3, shapes3 = ["a", "b"], [(5,), (130,)]
    f3 = sum(int(np.prod(s)) for s in shapes3)
    x3 = jax.random.normal(k3, prepend + (f3,), dtype=jnp.float32)
    ok &= _check(x3, keys3, shapes3)

    assert ok, "mismatch vs reference slicing"
    print("KERNEL_OK")
</pallas_src>

<mosaic_0001>
module attributes {stable_mosaic.version = 11 : i64} {
  func.func @_extract_keys_kernel(%arg0: i32, %arg1: memref<8x384xf32, #tpu.memory_space<vmem>>, %arg2: memref<8x256xf32, #tpu.memory_space<vmem>>, %arg3: memref<8x128xf32, #tpu.memory_space<vmem>>) attributes {dimension_semantics = [#tpu.dimension_semantics<parallel>], iteration_bounds = array<i64: 4>, scalar_prefetch = 0 : i64, scratch_operands = 0 : i64, tpu.core_type = #tpu.core_type<tc>, window_params = [{transform_indices = @transform_0, window_bounds = array<i64: 8, 384>}, {transform_indices = @transform_1, window_bounds = array<i64: 8, 256>}, {transform_indices = @transform_2, window_bounds = array<i64: 8, 128>}]} {
    %c0 = arith.constant 0 : index
    %c0_0 = arith.constant 0 : index
    %0 = vector.load %arg1[%c0, %c0_0] : memref<8x384xf32, #tpu.memory_space<vmem>>, vector<8x256xf32>
    %c0_1 = arith.constant 0 : index
    %c0_2 = arith.constant 0 : index
    %1 = vector.load %arg2[%c0_1, %c0_2] : memref<8x256xf32, #tpu.memory_space<vmem>>, vector<8x256xf32>
    tpu.vector_store %arg2[%c0_1, %c0_2], %0 {strides = array<i32>} : memref<8x256xf32, #tpu.memory_space<vmem>>, vector<8x256xf32>,
    %c0_3 = arith.constant 0 : index
    %c256 = arith.constant 256 : index
    %2 = vector.load %arg1[%c0_3, %c256] : memref<8x384xf32, #tpu.memory_space<vmem>>, vector<8x128xf32>
    %c0_4 = arith.constant 0 : index
    %c0_5 = arith.constant 0 : index
    %3 = vector.load %arg3[%c0_4, %c0_5] : memref<8x128xf32, #tpu.memory_space<vmem>>, vector<8x128xf32>
    tpu.vector_store %arg3[%c0_4, %c0_5], %2 {strides = array<i32>} : memref<8x128xf32, #tpu.memory_space<vmem>>, vector<8x128xf32>,
    return
  }
  func.func @transform_0(%arg0: i32) -> (i32, i32) {
    %c0_i32 = arith.constant 0 : i32
    %c0_i32_0 = arith.constant 0 : i32
    return %arg0, %c0_i32 : i32, i32
  }
  func.func @transform_1(%arg0: i32) -> (i32, i32) {
    %c0_i32 = arith.constant 0 : i32
    %c0_i32_0 = arith.constant 0 : i32
    return %arg0, %c0_i32 : i32, i32
  }
  func.func @transform_2(%arg0: i32) -> (i32, i32) {
    %c0_i32 = arith.constant 0 : i32
    %c0_i32_0 = arith.constant 0 : i32
    return %arg0, %c0_i32 : i32, i32
  }
}

</mosaic_0001>

<bundles_post_ra>
// kernel: tpu_custom_call.1
= control target key start
LH: loop header
LB: loop body
LE: loop exit
PB: predicated region body
PF: predicated region fallthrough
CT: control target
= control target key end

     0   :  { %8 = vsyncpa [#allocation3], 0  ;;  %s675_s0 = inlined_call_operand.hbm [shape: f32[32,390], index: 0, kind: input, shape index: {}]   ;;  %s676_s1 = inlined_call_operand.hbm [shape: f32[32,256], index: 1, kind: output, shape index: {0}]   ;;  %s677_s2 = inlined_call_operand.hbm [shape: f32[32,128], index: 2, kind: output, shape index: {1}]  }
   0x1   :  { %10 = vsyncpa [#allocation3 + $0x1], 0 }
   0x2   :  { %11 = vsyncpa [#allocation4], 0 }
   0x3   :  { %13 = vsyncpa [#allocation4 + $0x1], 0 }
   0x4   :  { %14 = vsyncpa [#allocation7], 0 }
   0x5   :  { %16 = vsyncpa [#allocation7 + $0x1], 0  ;;  %s533_s9 = smov 0   ;;  %s535_s10 = smov 0  }
   0x6   :  { %s537_s11 = smov 0   ;;  %s539_s12 = smov 0  }
   0x7 LB: > { %s554_s13 = sadd.s32 4294967295, %s516_s12   ;;  %s318_s14 = sadd.s32 4294967294, %s516_s12   ;;  %s516_s12 = sphi %s539_s12, %s685_s12   ;;  %s512_s11 = sphi %s537_s11, %s684_s11   ;;  %s508_s10 = sphi %s535_s10, %s683_s10   ;;  %s504_s9 = sphi %s533_s9, %s682_s9  }
   0x8   : > { %s558_s15 = sadd.s32 1, %s516_s12   ;;  %s29_s16 = sadd.s32 1, %s512_s11 }
   0x9   : > { %s26_s17 = ssub.s32 %s516_s12, %s558_s15  ;;  %p36_p0 = scmp.ne.s32.totalorder %s512_s11, %s508_s10 }
   0xa   : > { %p27_p1 = scmp.eq.s32.totalorder %s26_s17, 0  ;;  %p37_p2 = scmp.eq.s32.totalorder %s516_s12, 0 }
   0xb   : > { %p42_p3 = scmp.ne.s32.totalorder %s508_s10, %s504_s9  ;;  %p43_p4 = scmp.eq.s32.totalorder %s554_s13, 0 }
   0xc   : > { %s570_s18 = scalar_select %p27_p1, %s512_s11, %s29_s16  }
   0xd   : > { %p38_p5 = por %p37_p2, %p36_p0  ;;  %p572_p6 = por %p43_p4, %p42_p3 }
   0xe   : > { %p66_p7 = scmp.eq.s32.totalorder %s554_s13, 3  ;;  %p72_p8 = scmp.eq.s32.totalorder %s318_s14, 3 }
   0xf   : > { %p354_p9 = scmp.lt.s32.totalorder %s516_s12, 4  ;;  %s118_s22 = sand.u32 1, %s512_s11  }
  0x10   : > { %p578_p10 = por %p66_p7, %p36_p0  ;;  %p582_p11 = por %p72_p8, %p42_p3 }
  0x11   : > { %s333_s23 = sshll.u32 %s516_s12, 5  ;;  %s335_s24 = smul.u32 24, %s118_s22 }
  0x12   : > { %s127_s27 = scalar_lea.hbm %s675_s0, %s333_s23  ;;  %p591_p12 = pnand %p354_p9, %p38_p5 }
  0x13   : > { %s129_s29 = sshll.u32 %s127_s27, 4  ;;  %s122_s30 = scalar_lea.vmem [#allocation2], %s335_s24  ;;  %s130_s29 = int_to_ptr.hbm [resolvable:$true] %s129_s29 }
  0x14   : > { %s131_s3 = sshll.u32 %s122_s30, 4  ;;  %s119_s4 = scalar_lea.sflag [#allocation3], %s118_s22  ;;  %s132_s3 = int_to_ptr.vmem [resolvable:$true] %s131_s3 }
  0x15   : > { %s388_s5 = sshra.s32 %s130_s29, 4  ;;  %p392_p0 = pneg %p591_p12  ;;  %s389_s5 = int_to_ptr.hbm [resolvable:$true] %s388_s5 }
  0x16   : > { %s390_s6 = scalar_lea.hbm %s389_s5, 24  ;;  %s395_s14 = scalar_lea.hbm %s675_s0, 128 }
  0x17   : > { %p391_p13 = scmp.ne.s32.totalorder %s389_s5, %s390_s6  ;;  %p396_p3 = scmp.lt.s32.totalorder %s389_s5, %s675_s0 }
  0x18   : > { %p397_p4 = scmp.lt.s32.totalorder %s395_s14, %s390_s6 }
  0x19   : > { %p393_p1 = pnand %p392_p0, %p391_p13 }
  0x1a   : > { %p398_p5 = por %p397_p4, %p396_p3 }
  0x1b   : > { %p394_p2 = pneg %p393_p1 }
  0x1d   : > { %p399_p7 = pnand %p398_p5, %p394_p2 }
  0x1f   : > { %402 = shalt.err (!%p399_p7)
}
  0x20   : > { %346 = dma.hbm_to_vmem [thread:$0]  (!%p591_p12), %s130_s29, 384, %s132_s3, %s119_s4  }
  0x21   : > { %p323_p8 = scmp.ge.s32.totalorder %s516_s12, 1  ;;  %p136_p9 = scmp.lt.s32.totalorder %s516_s12, 5 }
  0x23   : > { %p137_p13 = pnand %p323_p8, %p136_p9 }
  0x24   : > { %s608_s22 = sand.u32 (!%p137_p13), 1, %s508_s10  }
  0x25   : > { %140 = sbr.rel (%p137_p13) target bundleno = 73 (0x49), region = 24  ;;  %s143_s24 = scalar_lea.sflag (!%p137_p13), [#allocation3], %s608_s22 }
  0x26   : > { %s336_s23 = smul.u32 (!%p137_p13), 24, %s608_s22 }
  0x28   : > { %s146_s25 = scalar_lea.vmem (!%p137_p13), [#allocation2], %s336_s23 }
  0x2a   : > { %491 = dma.done.wait (%p572_p6), %s143_s24, 384  }
  0x2b   : > { %493 = vsyncadd (%p572_p6), %s143_s24, 4294966912  ;;  %s324_s26 = sshll.u32 %s608_s22, 4  ;;  %s325_s27 = sshll.u32 %s608_s22, 3  ;;  %v173_v0 = vld [vmem:[%s146_s25] sm:$0xff]  ;;  %v174_v1 = vld [vmem:[%s146_s25 + $0x8] sm:$0xff] }
  0x2c   : > { %s165_s28 = scalar_lea.vmem [#allocation5], %s324_s26  ;;  %s172_s30 = scalar_lea.vmem [#allocation6], %s325_s27  ;;  %v177_v2 = vld [vmem:[%s146_s25 + $0x10] sm:$0xff] }
  0x2d   : > { %s198_s29 = sshll.u32 %s165_s28, 4  ;;  %s212_s3 = sshll.u32 %s172_s30, 4  ;;  %175 = vst [vmem:[%s165_s28] sm:$0xff] %v173_v0  ;;  %s618_s29 = int_to_ptr.vmem [resolvable:$true] %s198_s29  ;;  %s620_s3 = int_to_ptr.vmem [resolvable:$true] %s212_s3 }
  0x2e   : > { %s334_s4 = sshll.u32 %s554_s13, 4  ;;  %s330_s8 = sshll.u32 %s554_s13, 3  ;;  %176 = vst [vmem:[%s165_s28 + $0x8] sm:$0xff] %v174_v1 }
  0x2f   : > { %s196_s19 = scalar_lea.hbm %s676_s1, %s334_s4  ;;  %s210_s17 = scalar_lea.hbm %s677_s2, %s330_s8  ;;  %178 = vst [vmem:[%s172_s30] sm:$0xff] %v177_v2 }
  0x30   : > { %s200_s7 = sshll.u32 %s196_s19, 4  ;;  %s214_s23 = sshll.u32 %s210_s17, 4  ;;  %s201_s7 = int_to_ptr.hbm [resolvable:$true] %s200_s7  ;;  %s630_s23 = int_to_ptr.hbm [resolvable:$true] %s214_s23 }
  0x31   : > { %s180_s24 = scalar_lea.sflag [#allocation4], %s608_s22  ;;  %s432_s26 = sshra.s32 %s201_s7, 4  ;;  %s433_s26 = int_to_ptr.hbm [resolvable:$true] %s432_s26 }
  0x32   : > { %s434_s27 = scalar_lea.hbm %s433_s26, 16  ;;  %s438_s4 = scalar_lea.hbm %s676_s1, 64 }
  0x33   : > { %p435_p6 = scmp.ne.s32.totalorder %s433_s26, %s434_s27  ;;  %p439_p1 = scmp.lt.s32.totalorder %s433_s26, %s676_s1 }
  0x34   : > { %p440_p2 = scmp.lt.s32.totalorder %s438_s4, %s434_s27 }
  0x35   : > { %p436_p12 = pnand %p435_p6, %p578_p10 }
  0x36   : > { %p441_p3 = por %p440_p2, %p439_p1 }
  0x37   : > { %p437_p0 = pneg %p436_p12 }
  0x39   : > { %p442_p4 = pnand %p441_p3, %p437_p0 }
  0x3b   : > { %445 = shalt.err (!%p442_p4)
}
  0x3c   : > { %339 = dma.vmem_to_hbm [thread:$0]  (%p578_p10), %s618_s29, 256, %s201_s7, %s180_s24  }
  0x3d   : > { %s185_s28 = scalar_lea.sflag [#allocation7], %s608_s22  ;;  %s460_s30 = sshra.s32 %s630_s23, 4  ;;  %s461_s30 = int_to_ptr.hbm [resolvable:$true] %s460_s30 }
  0x3e   : > { %s462_s19 = scalar_lea.hbm %s461_s30, 8  ;;  %s466_s16 = scalar_lea.hbm %s677_s2, 32 }
  0x3f   : > { %p463_p5 = scmp.ne.s32.totalorder %s461_s30, %s462_s19  ;;  %p467_p9 = scmp.lt.s32.totalorder %s461_s30, %s677_s2 }
  0x40   : > { %p468_p13 = scmp.lt.s32.totalorder %s466_s16, %s462_s19 }
  0x41   : > { %p464_p7 = pnand %p463_p5, %p578_p10 }
  0x42   : > { %p469_p6 = por %p468_p13, %p467_p9 }
  0x43   : > { %p465_p8 = pneg %p464_p7 }
  0x45   : > { %p470_p12 = pnand %p469_p6, %p465_p8 }
  0x47   : > { %473 = shalt.err (!%p470_p12)
}
  0x48   : > { %340 = dma.vmem_to_hbm [thread:$0]  (%p578_p10), %s620_s3, 128, %s630_s23, %s185_s28  }
  0x49 PF: > { %p355_p0 = scmp.ge.s32.totalorder %s516_s12, 2  ;;  %s226_s22 = sand.u32 1, %s504_s9  }
  0x4a   : > { %s227_s29 = scalar_lea.sflag [#allocation4], %s226_s22 }
  0x4b   : > { %p348_p1 = pnand %p355_p0, %p582_p11 }
  0x4d   : > { %p349_p2 = pneg %p348_p1 }
  0x4f   : > { %495 = dma.done.wait (%p349_p2), %s227_s29, 256  }
  0x50   : > { %497 = vsyncadd (%p349_p2), %s227_s29, 4294967040  ;;  %s237_s7 = scalar_lea.sflag [#allocation7], %s226_s22 }
  0x51   : > { %499 = dma.done.wait (%p349_p2), %s237_s7, 128  }
  0x52   : > { %501 = vsyncadd (%p349_p2), %s237_s7, 4294967168  ;;  %p19_p10 = scmp.ge.s32.totalorder %s558_s15, 6   ;;  %s682_s9 = smov %s508_s10 }
  0x53   : > { %s683_s10 = smov %s512_s11  ;;  %s684_s11 = smov %s570_s18 }
  0x54   : > { %s685_s12 = smov %s558_s15  ;;  %21 = sbr.rel (!%p19_p10) target bundleno = 7 (0x7), region = 86 }
  0x59   :  { %243 = vsyncpa [#allocation3], 1 }
  0x5a   :  { %245 = vsyncpa [#allocation3 + $0x1], 1 }
  0x5b   :  { %246 = vsyncpa [#allocation4], 1 }
  0x5c   :  { %248 = vsyncpa [#allocation4 + $0x1], 1 }
  0x5d   :  { %249 = vsyncpa [#allocation7], 1 }
  0x5e   :  { %251 = vsyncpa [#allocation7 + $0x1], 1 }

</bundles_post_ra>
